<compile_context>
chip_gen: v7x
topology: tpu7x:2x2x1
jax: 0.10.0
libtpu: 0.0.40
codegen_flags: <defaults>
</compile_context>

<pallas_src>
import math

import jax
import jax.numpy as jnp
from jax import lax
from jax.experimental import pallas as pl
from jax.experimental.pallas import tpu as pltpu

_INV_SQRT2 = 1.0 / math.sqrt(2.0)


def _round_up(x, m):
    return ((x + m - 1) // m) * m


# ----------------------------------------------------------------------------
# Kernel: one (row block, vocab block) tile of  GELU(x @ W1 + b1) @ W2 + b2
#   x_ref  : (tm, E)   bf16   (row tile of activations)
#   w1_ref : (E, H)    bf16   (pre-transposed (in, out), hidden padded to H)
#   b1_ref : (1, H)    f32
#   w2_ref : (H, tn)   bf16   (pre-transposed (in, out), vocab tile j)
#   b2_ref : (1, tn)   f32
#   out_ref: (tm, tn)  out_dtype
#   h_ref  : (tm, H)   bf16   persistent VMEM scratch (GELU(fc1) for this row block)
# ----------------------------------------------------------------------------
def _decoder_kernel(x_ref, w1_ref, b1_ref, w2_ref, b2_ref, out_ref, h_ref):
    @pl.when(pl.program_id(1) == 0)
    def _():
        # fc1 on the MXU with f32 accumulation; exact GELU (erf -> EUP) in f32.
        h = jnp.dot(x_ref[...], w1_ref[...],
                    preferred_element_type=jnp.float32) + b1_ref[...]
        h = 0.5 * h * (1.0 + lax.erf(h * _INV_SQRT2))
        h_ref[...] = h.astype(h_ref.dtype)

    # fc2 on the MXU for this vocab tile (bf16 operands, f32 accumulation).
    y = jnp.dot(h_ref[...], w2_ref[...],
                preferred_element_type=jnp.float32) + b2_ref[...]
    out_ref[...] = y.astype(out_ref.dtype)


# ----------------------------------------------------------------------------
# One-time parameter prep (hoist out of the hot path / do at model-load time).
# PyTorch nn.Linear layout in: fc1_w (E, E), fc1_b (E,), fc2_w (V, E), fc2_b (V,).
# ----------------------------------------------------------------------------
def prepare_decoder_params(params, *, block_cols=512, compute_dtype=jnp.bfloat16):
    E = params["fc1_w"].shape[1]
    V = params["fc2_w"].shape[0]

    H = _round_up(E, 128)                                 # lane-dense hidden dim
    tn = min(_round_up(block_cols, 128), _round_up(V, 128))
    V_pad = _round_up(V, tn)

    # Pre-transpose to (in, out), cast to MXU dtype, zero-pad the hidden/vocab dims.
    # Zero padding is exact: GELU(0 + 0) = 0 and padded w2 rows are zero.
    w1 = jnp.pad(params["fc1_w"].T.astype(compute_dtype), ((0, 0), (0, H - E)))
    b1 = jnp.pad(params["fc1_b"].astype(jnp.float32), (0, H - E)).reshape(1, H)
    w2 = jnp.pad(params["fc2_w"].T.astype(compute_dtype),
                 ((0, H - E), (0, V_pad - V)))
    b2 = jnp.pad(params["fc2_b"].astype(jnp.float32), (0, V_pad - V)).reshape(1, V_pad)

    return dict(w1=w1, b1=b1, w2=w2, b2=b2,
                embed_dim=E, hidden_pad=H, vocab_size=V, vocab_pad=V_pad,
                block_cols=tn, compute_dtype=compute_dtype)


# ----------------------------------------------------------------------------
# Forward wrapper (eval-mode): dropout (identity) -> GELU(fc1) -> fc2.
# ----------------------------------------------------------------------------
def sequence_decoder(x, prepped, *, block_rows=256, out_dtype=jnp.bfloat16):
    E = prepped["embed_dim"]
    H = prepped["hidden_pad"]
    V = prepped["vocab_size"]
    V_pad = prepped["vocab_pad"]
    tn = prepped["block_cols"]
    cdt = prepped["compute_dtype"]

    assert x.shape[-1] == E
    orig_lead = x.shape[:-1]
    M = int(math.prod(orig_lead)) if orig_lead else 1

    # Fold all leading dims into the matmul M dimension (no activation padding).
    x2 = x.reshape(M, E).astype(cdt)

    row_align = 16 if cdt == jnp.bfloat16 else 8          # sublane packing
    tm = min(_round_up(block_rows, row_align), _round_up(M, row_align))

    grid = (pl.cdiv(M, tm), V_pad // tn)

    c_bytes = jnp.dtype(cdt).itemsize
    o_bytes = jnp.dtype(out_dtype).itemsize

    # Shape-derived scoped-VMEM limit (double-buffered inputs/outputs + h scratch),
    # capped at 64 MiB so the configuration also fits v7x's physical VMEM.
    vmem_need = (2 * tm * E * c_bytes          # x
                 + 2 * E * H * c_bytes         # w1
                 + 2 * H * 4                   # b1
                 + 2 * H * tn * c_bytes        # w2
                 + 2 * tn * 4                  # b2
                 + 2 * tm * tn * o_bytes       # out
                 + tm * H * c_bytes)           # h scratch
    vmem_limit = int(min(64 * 1024 * 1024, max(32 * 1024 * 1024, 2 * vmem_need)))

    cost = pl.CostEstimate(
        flops=2 * M * E * H + 2 * M * H * V_pad,
        transcendentals=M * H,                              # erf per hidden element
        bytes_accessed=(M * E * c_bytes + E * H * c_bytes
                        + grid[0] * H * V_pad * c_bytes     # w2 re-streamed per row block
                        + (H + V_pad) * 4
                        + M * V_pad * o_bytes),
    )

    grid_spec = pltpu.PrefetchScalarGridSpec(
        num_scalar_prefetch=0,
        grid=grid,
        in_specs=[
            pl.BlockSpec((tm, E), lambda i, j: (i, 0)),     # activations: row tile
            pl.BlockSpec((E, H), lambda i, j: (0, 0)),      # w1 (resident)
            pl.BlockSpec((1, H), lambda i, j: (0, 0)),      # b1 (resident)
            pl.BlockSpec((H, tn), lambda i, j: (0, j)),     # w2: vocab tile
            pl.BlockSpec((1, tn), lambda i, j: (0, j)),     # b2: vocab tile
        ],
        out_specs=pl.BlockSpec((tm, tn), lambda i, j: (i, j)),   # lane-dense tiles
        scratch_shapes=[pltpu.VMEM((tm, H), cdt)],          # persistent GELU(fc1)
    )

    out = pl.pallas_call(
        _decoder_kernel,
        out_shape=jax.ShapeDtypeStruct((M, V), out_dtype),
        grid_spec=grid_spec,
        compiler_params=pltpu.CompilerParams(
            # rows independent (megacore-shardable); vocab tiles of a row block
            # must run sequentially on one core for the h-scratch reuse.
            dimension_semantics=("parallel", "arbitrary"),
            vmem_limit_bytes=vmem_limit,
        ),
        cost_estimate=cost,
    )(x2, prepped["w1"], prepped["b1"], prepped["w2"], prepped["b2"])

    return out.reshape(orig_lead + (V,))


# ----------------------------------------------------------------------------
# Pure-JAX f32 reference (eval-mode forward of the PyTorch module)
# ----------------------------------------------------------------------------
def ref_forward(x, params):
    h = jnp.einsum("...e,fe->...f", x, params["fc1_w"]) + params["fc1_b"]
    h = jax.nn.gelu(h, approximate=False)
    return jnp.einsum("...f,vf->...v", h, params["fc2_w"]) + params["fc2_b"]


if __name__ == "__main__":
    B, L, E, V = 4, 8, 32, 256                              # small demo shapes

    key = jax.random.PRNGKey(0)
    k1, k2, k3, k4, k5 = jax.random.split(key, 5)
    params = dict(
        fc1_w=jax.random.normal(k1, (E, E), jnp.float32) * 0.05,
        fc1_b=jax.random.normal(k2, (E,), jnp.float32) * 0.05,
        fc2_w=jax.random.normal(k3, (V, E), jnp.float32) * 0.05,
        fc2_b=jax.random.normal(k4, (V,), jnp.float32) * 0.05,
    )
    x = jax.random.normal(k5, (B, L, E), jnp.float32)

    # One-time weight prep (transpose/cast/pad) outside the hot path.
    # block_cols=128, block_rows=16 -> grid=(2, 2): exercises both the row pipeline
    # and the vocab tiling with h-scratch reuse at these tiny shapes.
    prepped = prepare_decoder_params(params, block_cols=128)
    out = sequence_decoder(x, prepped, block_rows=16)
    jax.block_until_ready(out)

    ref = ref_forward(x, params)
    assert out.shape == (B, L, V)
    err = float(jnp.max(jnp.abs(out.astype(jnp.float32) - ref)))
    assert jnp.allclose(out.astype(jnp.float32), ref, atol=2e-2, rtol=2e-2), \
        f"max abs err={err}"

    print("KERNEL_OK")
</pallas_src>

<mosaic_0001>
module attributes {stable_mosaic.version = 11 : i64} {
  func.func @_decoder_kernel(%arg0: i32, %arg1: i32, %arg2: memref<16x32xbf16, #tpu.memory_space<vmem>>, %arg3: memref<32x128xbf16, #tpu.memory_space<vmem>>, %arg4: memref<1x128xf32, #tpu.memory_space<vmem>>, %arg5: memref<128x128xbf16, #tpu.memory_space<vmem>>, %arg6: memref<1x128xf32, #tpu.memory_space<vmem>>, %arg7: memref<16x128xbf16, #tpu.memory_space<vmem>>, %arg8: memref<16x128xbf16, #tpu.memory_space<vmem>>) attributes {dimension_semantics = [#tpu.dimension_semantics<parallel>, #tpu.dimension_semantics<arbitrary>], iteration_bounds = array<i64: 2, 2>, scalar_prefetch = 0 : i64, scratch_operands = 1 : i64, tpu.core_type = #tpu.core_type<tc>, window_params = [{transform_indices = @transform_0, window_bounds = array<i64: 16, 32>}, {pipeline_mode = #tpu.pipeline_mode<synchronous>, transform_indices = @transform_1, window_bounds = array<i64: 32, 128>}, {pipeline_mode = #tpu.pipeline_mode<synchronous>, transform_indices = @transform_2, window_bounds = array<i64: 1, 128>}, {transform_indices = @transform_3, window_bounds = array<i64: 128, 128>}, {transform_indices = @transform_4, window_bounds = array<i64: 1, 128>}, {transform_indices = @transform_5, window_bounds = array<i64: 16, 128>}]} {
    %c0_i32 = arith.constant 0 : i32
    %0 = arith.cmpi eq, %arg1, %c0_i32 : i32
    %1 = arith.extui %0 : i1 to i32
    %c0_i32_0 = arith.constant 0 : i32
    %2 = arith.cmpi ne, %1, %c0_i32_0 : i32
    scf.if %2 {
      %c0_8 = arith.constant 0 : index
      %c0_9 = arith.constant 0 : index
      %11 = vector.load %arg2[%c0_8, %c0_9] : memref<16x32xbf16, #tpu.memory_space<vmem>>, vector<16x32xbf16>
      %c0_10 = arith.constant 0 : index
      %c0_11 = arith.constant 0 : index
      %12 = vector.load %arg3[%c0_10, %c0_11] : memref<32x128xbf16, #tpu.memory_space<vmem>>, vector<32x128xbf16>
      %cst_12 = arith.constant dense<0.000000e+00> : vector<16x128xf32>
      %13 = tpu.matmul %11, %12, %cst_12 {dimension_numbers = #tpu.dot_dimension_numbers<[1], [0], [0], [1], [0, 0, 1, 1], [], []>} : vector<16x32xbf16>, vector<32x128xbf16>, vector<16x128xf32> -> vector<16x128xf32>
      %c0_13 = arith.constant 0 : index
      %c0_14 = arith.constant 0 : index
      %14 = vector.load %arg4[%c0_13, %c0_14] : memref<1x128xf32, #tpu.memory_space<vmem>>, vector<1x128xf32>
      %15 = vector.broadcast %14 : vector<1x128xf32> to vector<16x128xf32>
      %16 = arith.addf %13, %15 : vector<16x128xf32>
      %cst_15 = arith.constant 5.000000e-01 : f32
      %17 = vector.broadcast %cst_15 : f32 to vector<16x128xf32>
      %18 = arith.mulf %17, %16 : vector<16x128xf32>
      %cst_16 = arith.constant 0.707106769 : f32
      %19 = vector.broadcast %cst_16 : f32 to vector<16x128xf32>
      %20 = arith.mulf %16, %19 : vector<16x128xf32>
      %21 = math.erf %20 : vector<16x128xf32>
      %cst_17 = arith.constant 1.000000e+00 : f32
      %22 = vector.broadcast %cst_17 : f32 to vector<16x128xf32>
      %23 = arith.addf %22, %21 : vector<16x128xf32>
      %24 = arith.mulf %18, %23 : vector<16x128xf32>
      %25 = arith.truncf %24 : vector<16x128xf32> to vector<16x128xbf16>
      %c0_18 = arith.constant 0 : index
      %c0_19 = arith.constant 0 : index
      %26 = vector.load %arg8[%c0_18, %c0_19] : memref<16x128xbf16, #tpu.memory_space<vmem>>, vector<16x128xbf16>
      tpu.vector_store %arg8[%c0_18, %c0_19], %25 {strides = array<i32>} : memref<16x128xbf16, #tpu.memory_space<vmem>>, vector<16x128xbf16>,
    } else {
    }
    %c0 = arith.constant 0 : index
    %c0_1 = arith.constant 0 : index
    %3 = vector.load %arg8[%c0, %c0_1] : memref<16x128xbf16, #tpu.memory_space<vmem>>, vector<16x128xbf16>
    %c0_2 = arith.constant 0 : index
    %c0_3 = arith.constant 0 : index
    %4 = vector.load %arg5[%c0_2, %c0_3] : memref<128x128xbf16, #tpu.memory_space<vmem>>, vector<128x128xbf16>
    %cst = arith.constant dense<0.000000e+00> : vector<16x128xf32>
    %5 = tpu.matmul %3, %4, %cst {dimension_numbers = #tpu.dot_dimension_numbers<[1], [0], [0], [1], [0, 0, 1, 1], [], []>} : vector<16x128xbf16>, vector<128x128xbf16>, vector<16x128xf32> -> vector<16x128xf32>
    %c0_4 = arith.constant 0 : index
    %c0_5 = arith.constant 0 : index
    %6 = vector.load %arg6[%c0_4, %c0_5] : memref<1x128xf32, #tpu.memory_space<vmem>>, vector<1x128xf32>
    %7 = vector.broadcast %6 : vector<1x128xf32> to vector<16x128xf32>
    %8 = arith.addf %5, %7 : vector<16x128xf32>
    %9 = arith.truncf %8 : vector<16x128xf32> to vector<16x128xbf16>
    %c0_6 = arith.constant 0 : index
    %c0_7 = arith.constant 0 : index
    %10 = vector.load %arg7[%c0_6, %c0_7] : memref<16x128xbf16, #tpu.memory_space<vmem>>, vector<16x128xbf16>
    tpu.vector_store %arg7[%c0_6, %c0_7], %9 {strides = array<i32>} : memref<16x128xbf16, #tpu.memory_space<vmem>>, vector<16x128xbf16>,
    return
  }
  func.func @transform_0(%arg0: i32, %arg1: i32) -> (i32, i32) {
    %c0_i32 = arith.constant 0 : i32
    %c0_i32_0 = arith.constant 0 : i32
    return %arg0, %c0_i32 : i32, i32
  }
  func.func @transform_1(%arg0: i32, %arg1: i32) -> (i32, i32) {
    %c0_i32 = arith.constant 0 : i32
    %c0_i32_0 = arith.constant 0 : i32
    %c0_i32_1 = arith.constant 0 : i32
    return %c0_i32, %c0_i32_0 : i32, i32
  }
  func.func @transform_2(%arg0: i32, %arg1: i32) -> (i32, i32) {
    %c0_i32 = arith.constant 0 : i32
    %c0_i32_0 = arith.constant 0 : i32
    %c0_i32_1 = arith.constant 0 : i32
    return %c0_i32, %c0_i32_0 : i32, i32
  }
  func.func @transform_3(%arg0: i32, %arg1: i32) -> (i32, i32) {
    %c0_i32 = arith.constant 0 : i32
    %c0_i32_0 = arith.constant 0 : i32
    return %c0_i32, %arg1 : i32, i32
  }
  func.func @transform_4(%arg0: i32, %arg1: i32) -> (i32, i32) {
    %c0_i32 = arith.constant 0 : i32
    %c0_i32_0 = arith.constant 0 : i32
    return %c0_i32, %arg1 : i32, i32
  }
  func.func @transform_5(%arg0: i32, %arg1: i32) -> (i32, i32) {
    %c0_i32 = arith.constant 0 : i32
    return %arg0, %arg1 : i32, i32
  }
}

</mosaic_0001>

<bundles_post_ra>
// kernel: tpu_custom_call.1
= control target key start
LH: loop header
LB: loop body
LE: loop exit
PB: predicated region body
PF: predicated region fallthrough
CT: control target
= control target key end

     0   :  { %s1648_s0 = inlined_call_operand.hbm [shape: bf16[32,32], index: 0, kind: input, shape index: {}]   ;;  %s1649_s1 = inlined_call_operand.hbm [shape: bf16[32,128], index: 1, kind: input, shape index: {}]   ;;  %s1650_s2 = inlined_call_operand.vmem [shape: f32[1,128], index: 2, kind: input, shape index: {}]   ;;  %s1651_s3 = inlined_call_operand.hbm [shape: bf16[128,256], index: 3, kind: input, shape index: {}]   ;;  %s1652_s4 = inlined_call_operand.vmem [shape: f32[1,256], index: 4, kind: input, shape index: {}]   ;;  %s1653_s5 = inlined_call_operand.hbm [shape: bf16[32,256], index: 5, kind: output, shape index: {}]  }
   0x1   :  { %1674 = sst [smem:[#allocation25_spill]] %s1648_s0 }
   0x2   :  { %1675 = sst [smem:[#allocation26_spill]] %s1650_s2 }
   0x3   :  { %1676 = sst [smem:[#allocation27_spill]] %s1652_s4 }
   0x4   :  { %1677 = sst [smem:[#allocation28_spill]] %s1653_s5 }
   0x5   :  { %10 = vsyncpa [#allocation4], 0 }
   0x6   :  { %12 = vsyncpa [#allocation4 + $0x1], 0 }
   0x7   :  { %13 = vsyncpa [#allocation7], 0 }
   0x8   :  { %14 = vsyncpa [#allocation5], 0 }
   0x9   :  { %16 = vsyncpa [#allocation5 + $0x1], 0  ;;  %s1222_s18 = smov 0   ;;  %s1224_s19 = smov 0  }
   0xa   :  { %s1226_s20 = smov 0   ;;  %s1228_s21 = smov 0  }
   0xb   :  { %s1230_s22 = smov 0   ;;  %s1232_s23 = smov 0  }
   0xc   :  { %s1234_s24 = smov 0   ;;  %s1236_s25 = smov 0  }
   0xd   :  { %s1238_s26 = smov 0   ;;  %s1240_s27 = smov 0  }
   0xe   :  { %s1242_s28 = smov 0   ;;  %s1244_s29 = smov 0  }
   0xf   :  { %s1246_s30 = smov 0   ;;  %s1248_s6 = smov 0  }
  0x10 LB: > { %1678 = sst [smem:[#allocation14_spill]] %s1144_s23  ;;  %s31_s7 = sadd.s32 1, %s1168_s29  ;;  %s1176_s6 = sphi %s1248_s6, %s22_s6   ;;  %s1172_s30 = sphi %s1246_s30, %s1729_s30   ;;  %s1168_s29 = sphi %s1244_s29, %s1728_s29   ;;  %s1164_s28 = sphi %s1242_s28, %s1727_s28   ;;  %s1160_s27 = sphi %s1240_s27, %s1726_s27   ;;  %s1156_s26 = sphi %s1238_s26, %s1739_s26   ;;  %s1152_s25 = sphi %s1236_s25, %s1738_s25   ;;  %s1148_s24 = sphi %s1234_s24, %s1737_s24   ;;  %s1144_s23 = sphi %s1232_s23, %s1736_s23   ;;  %s1140_s22 = sphi %s1230_s22, %s1735_s22   ;;  %s1136_s21 = sphi %s1228_s21, %s1734_s21   ;;  %s1132_s20 = sphi %s1226_s20, %s1733_s20   ;;  %s1128_s19 = sphi %s1224_s19, %s1732_s19   ;;  %s1124_s18 = sphi %s1222_s18, %s1731_s18  }
  0x11   : > { %1679 = sst [smem:[#allocation15_spill]] %s1156_s26  ;;  %s34_s8 = sadd.s32 1, %s1172_s30 }
  0x12   : > { %1680 = sst [smem:[#allocation16_spill]] %s1160_s27  ;;  %p32_p0 = scmp.ge.s32.totalorder %s31_s7, 2 }
  0x13   : > { %1681 = sst [smem:[#allocation17_spill]] %s1164_s28  ;;  %s41_s9 = sadd.s32 1, %s1156_s26 }
  0x14   : > { %1682 = sst [smem:[#allocation18_spill]] %s1168_s29  ;;  %p48_p1 = scmp.ne.s32.totalorder %s1156_s26, %s1152_s25 }
  0x15   : > { %1683 = sst [smem:[#allocation19_spill]] %s1172_s30  ;;  %p1659_p2 = scmp.eq.s32.totalorder %s1176_s6, 0 }
  0x16   : > { %s1741_s7 = smov (%p32_p0, %s31_s7), 0  ;;  %s1743_s8 = smov (!%p32_p0, %s34_s8), %s1172_s30 }
  0x17   : > { %1684 = sst [smem:[#allocation20_spill]] %s1741_s7  ;;  %p1303_p3 = por %p1659_p2, %p48_p1 }
  0x18   : > { %s1309_s11 = ssub.s32 %s1168_s29, %s1741_s7  ;;  %p36_p4 = scmp.ge.s32.totalorder %s1743_s8, 2 }
  0x19   : > { %p107_p5 = scmp.eq.s32.totalorder %s1309_s11, 0  ;;  %s163_s12 = sadd.s32 1, %s1132_s20 }
  0x1a   : > { %s1745_s8 = smov (%p36_p4, %s1743_s8), 0  ;;  %p1658_p6 = scmp.lt.s32.totalorder %s1176_s6, 4 }
  0x1b   : > { %1686 = sst [smem:[#allocation21_spill]] %s1745_s8  ;;  %s38_s13 = ssub.s32 %s1172_s30, %s1745_s8 }
  0x1c   : > { %p39_p7 = scmp.eq.s32.totalorder %s38_s13, 0  ;;  %s160_s14 = sor.u32 %s1309_s11, %s38_s13 }
  0x1d   : > { %p161_p8 = scmp.eq.s32.totalorder %s160_s14, 0  ;;  %s216_s15 = sand.u32 1, %s1176_s6  }
  0x1e   : > { %s1321_s16 = scalar_select %p39_p7, %s1156_s26, %s41_s9  }
  0x1f   : > { %s1324_s17 = scalar_select %p161_p8, %s1132_s20, %s163_s12  }
  0x20   : > { %1687 = sst [smem:[#allocation22_spill]] %s1321_s16  ;;  %s218_s7 = sand.u32 1, %s1156_s26  }
  0x21   : > { %1688 = sst [smem:[#allocation23_spill]] %s1324_s17  ;;  %s685_s5 = sshll.u32 %s218_s7, 3 }
  0x22   : > { %s718_s28 = sshll.u32 %s1172_s30, 7  ;;  %s1689_s0 = sld [smem:[#allocation25_spill]] }
  0x23   : > { %s220_s8 = scalar_lea.vmem [#allocation3], %s685_s5  ;;  %p1337_p9 = pnand %p1658_p6, %p1303_p3 }
  0x24   : > { %s227_s13 = sshll.u32 %s220_s8, 4  ;;  %s1343_s7 = scalar_lea.sflag [#allocation4], %s216_s15  ;;  %s1341_s13 = int_to_ptr.vmem [resolvable:$true] %s227_s13 }
  0x25   : > { %p936_p11 = pneg %p1337_p9 }
  0x28   : > { %s1331_s27 = scalar_lea.hbm %s1689_s0, %s718_s28  ;;  %s939_s28 = scalar_lea.hbm %s1689_s0, 256 }
  0x29   : > { %s934_s2 = scalar_lea.hbm %s1331_s27, 128  ;;  %p940_p0 = scmp.lt.u32.totalorder %s1331_s27, %s1689_s0 }
  0x2a   : > { %p935_p10 = scmp.ne.s32.totalorder %s1331_s27, %s934_s2  ;;  %p941_p1 = scmp.lt.u32.totalorder %s939_s28, %s934_s2 }
  0x2b   : > { %p943_p4 = scmp.lt.u32.totalorder %s934_s2, %s1331_s27 }
  0x2c   : > { %p937_p12 = pnand %p936_p11, %p935_p10  ;;  %p942_p3 = por %p941_p1, %p940_p0 }
  0x2e   : > { %p938_p13 = pneg %p937_p12  ;;  %p944_p7 = por %p943_p4, %p942_p3 }
  0x30   : > { %p945_p8 = pnand %p944_p7, %p938_p13 }
  0x32   : > { %948 = shalt.err (!%p945_p8)
}
  0x33   : > { %s949_s12 = scalar_lea.vmem %s1341_s13, 128  ;;  %s1178_s14 = smov [#allocation3]  }
  0x34   : > { %p950_p10 = scmp.ne.s32.totalorder %s1341_s13, %s949_s12  ;;  %s954_s15 = sshll.u32 %s1178_s14, 4  ;;  %s955_s15 = int_to_ptr.vmem [resolvable:$false] %s954_s15 }
  0x35   : > { %s956_s4 = scalar_lea.vmem %s955_s15, 256  ;;  %p957_p2 = scmp.lt.s32.totalorder %s1341_s13, %s955_s15 }
  0x36   : > { %p952_p12 = pnand %p950_p10, %p936_p11  ;;  %p958_p0 = scmp.lt.s32.totalorder %s956_s4, %s949_s12 }
  0x38   : > { %p953_p6 = pneg %p952_p12  ;;  %p959_p1 = por %p958_p0, %p957_p2 }
  0x3a   : > { %p960_p3 = pnand %p959_p1, %p953_p6 }
  0x3c   : > { %963 = shalt.err (!%p960_p3)
}
  0x3d   : > { %s1660_s2 = smov 64   ;;  %s1662_s5 = smov 4  }
  0x3e   : > { %784 = dma.hbm_to_vmem [thread:$0]  (!%p1337_p9), %s1331_s27, 128, %s1341_s13, %s1343_s7, %s1660_s2, %s1660_s2, %s1662_s5  }
  0x3f   : > { %s1375_s28 = sadd.s32 4294967295, %s1176_s6   ;;  %s681_s8 = sadd.s32 4294967294, %s1176_s6  }
  0x40   : > { %p54_p2 = scmp.ne.s32.totalorder %s1152_s25, %s1148_s24  ;;  %p1668_p6 = scmp.eq.s32.totalorder %s1375_s28, 0 }
  0x41   : > { %s109_s10 = sadd.s32 1, %s1144_s23  ;;  %p116_p11 = scmp.ne.s32.totalorder %s1144_s23, %s1140_s22 }
  0x42   : > { %p1386_p13 = por %p1668_p6, %p54_p2  ;;  %p122_p4 = scmp.ne.s32.totalorder %s1140_s22, %s1136_s21 }
  0x43   : > { %s1395_s27 = scalar_select %p107_p5, %s1144_s23, %s109_s10  }
  0x44   : > { %s1691_s9 = scalar_select %p1386_p13, 1, 0 }
  0x45   : > { %1692 = sst [smem:[#allocation24_spill]] %s1395_s27  ;;  %p1693_p9 = scmp.eq.s32.totalorder %s1176_s6, 0 }
  0x46   : > { %p1405_p8 = por %p122_p4, %p1668_p6  ;;  %p173_p10 = scmp.ne.s32.totalorder %s1132_s20, %s1128_s19 }
  0x47   : > { %p1399_p7 = por %p116_p11, %p1693_p9  ;;  %p174_p12 = scmp.eq.s32.totalorder %s1375_s28, 3 }
  0x48   : > { %s1695_s24 = scalar_select %p1405_p8, 1, 0 }
  0x49   : > { %p179_p0 = scmp.ne.s32.totalorder %s1128_s19, %s1124_s18  ;;  %p180_p1 = scmp.eq.s32.totalorder %s681_s8, 3 }
  0x4a   : > { %p1414_p5 = por %p174_p12, %p173_p10  ;;  %p682_p3 = scmp.ge.s32.totalorder %s1176_s6, 1 }
  0x4b   : > { %p1419_p2 = por %p180_p1, %p179_p0  ;;  %p187_p11 = scmp.lt.s32.totalorder %s1176_s6, 5 }
  0x4c   : > { %s1696_s21 = scalar_select %p1414_p5, 1, 0 }
  0x4d   : > { %s1697_s11 = scalar_select %p1419_p2, 1, 0 }
  0x4e   : > { %p1424_p4 = pnand %p682_p3, %p187_p11  ;;  %s1181_s14 = smov [#allocation6]  }
  0x4f   : > { %s199_s15 = sshll.u32 %s1181_s14, 4  ;;  %p1699_p9 = scmp.lt.s32.totalorder %s1176_s6, 4  ;;  %s1428_s15 = int_to_ptr.vmem [resolvable:$true] %s199_s15 }
  0x50   : > { %s1698_s12 = scalar_select %p1424_p4, 1, 0 }
  0x51   : > { %p1434_p10 = pnand %p1699_p9, %p1399_p7  ;;  %p777_p12 = pneg %p1424_p4 }
  0x52   : > { %s239_s8 = sand.u32 1, %s1144_s23   ;;  %s689_s5 = sshll.u32 %s1168_s29, 6 }
  0x53   : > { %s1700_s4 = scalar_select %p1434_p10, 1, 0 }
  0x54   : > { %s688_s10 = sshll.u32 %s239_s8, 6  ;;  %p1443_p0 = pnand %p777_p12, %p1668_p6 }
  0x55   : > { %s241_s14 = scalar_lea.vmem [#allocation8], %s688_s10  ;;  %s1451_s16 = scalar_lea.hbm %s1651_s3, %s689_s5 }
  0x56   : > { %s247_s0 = sshll.u32 %s241_s14, 4  ;;  %s964_s17 = scalar_lea.hbm %s1649_s1, 256  ;;  %s1477_s0 = int_to_ptr.vmem [resolvable:$true] %s247_s0 }
  0x57   : > { %p965_p7 = scmp.ne.s32.totalorder %s1649_s1, %s964_s17  ;;  %p966_p1 = pneg %p1443_p0 }
  0x58   : > { %p971_p9 = scmp.lt.u32.totalorder %s964_s17, %s1649_s1 }
  0x59   : > { %p967_p3 = pnand %p966_p1, %p965_p7 }
  0x5b   : > { %p968_p11 = pneg %p967_p3 }
  0x5d   : > { %p973_p12 = pnand %p971_p9, %p968_p11 }
  0x5f   : > { %976 = shalt.err (!%p973_p12)
}
  0x60   : > { %s977_s30 = scalar_lea.vmem %s1428_s15, 256  ;;  %p985_p8 = scmp.lt.s32.totalorder %s1428_s15, %s1428_s15 }
  0x61   : > { %p978_p6 = scmp.ne.s32.totalorder %s1428_s15, %s977_s30  ;;  %p986_p13 = scmp.lt.s32.totalorder %s977_s30, %s977_s30 }
  0x63   : > { %p980_p2 = pnand %p978_p6, %p966_p1  ;;  %p987_p4 = por %p986_p13, %p985_p8 }
  0x65   : > { %p981_p5 = pneg %p980_p2 }
  0x67   : > { %p988_p10 = pnand %p987_p4, %p981_p5 }
  0x69   : > { %991 = shalt.err (!%p988_p10)
}
  0x6a   : > { %s1702_s23 = smov 4   ;;  %s1703_s26 = smov 64  }
  0x6b   : > { %780 = dma.hbm_to_vmem [thread:$0]  (!%p1443_p0), %s1649_s1, 256, %s1428_s15, [#allocation7], %s1703_s26, %s1703_s26, %s1702_s23  }
  0x6c   : > { %s992_s5 = scalar_lea.hbm %s1451_s16, 1024  ;;  %p1704_p13 = scmp.ne.s32.totalorder %s1700_s4, 0 }
  0x6d   : > { %p993_p6 = scmp.ne.s32.totalorder %s1451_s16, %s992_s5  ;;  %s997_s14 = scalar_lea.hbm %s1651_s3, 2048 }
  0x6e   : > { %p994_p8 = pneg %p1704_p13  ;;  %p998_p4 = scmp.lt.u32.totalorder %s1451_s16, %s1651_s3 }
  0x6f   : > { %p999_p10 = scmp.lt.u32.totalorder %s997_s14, %s992_s5  ;;  %p1001_p7 = scmp.lt.u32.totalorder %s992_s5, %s1451_s16 }
  0x70   : > { %p995_p5 = pnand %p994_p8, %p993_p6 }
  0x71   : > { %p1000_p0 = por %p999_p10, %p998_p4 }
  0x72   : > { %p996_p2 = pneg %p995_p5 }
  0x73   : > { %p1002_p1 = por %p1001_p7, %p1000_p0 }
  0x75   : > { %p1003_p3 = pnand %p1002_p1, %p996_p2 }
  0x77   : > { %1006 = shalt.err (!%p1003_p3)
}
  0x78   : > { %s1007_s15 = scalar_lea.vmem %s1477_s0, 1024  ;;  %s1182_s10 = smov [#allocation8]  }
  0x79   : > { %p1008_p11 = scmp.ne.s32.totalorder %s1477_s0, %s1007_s15  ;;  %s1012_s30 = sshll.u32 %s1182_s10, 4  ;;  %s1013_s30 = int_to_ptr.vmem [resolvable:$false] %s1012_s30 }
  0x7a   : > { %s1014_s29 = scalar_lea.vmem %s1013_s30, 2048  ;;  %p1015_p6 = scmp.lt.s32.totalorder %s1477_s0, %s1013_s30 }
  0x7b   : > { %p1010_p9 = pnand %p1008_p11, %p994_p8  ;;  %p1016_p5 = scmp.lt.s32.totalorder %s1014_s29, %s1007_s15 }
  0x7d   : > { %p1011_p12 = pneg %p1010_p9  ;;  %p1017_p4 = por %p1016_p5, %p1015_p6 }
  0x7f   : > { %p1018_p10 = pnand %p1017_p4, %p1011_p12 }
  0x81   : > { %1021 = shalt.err (!%p1018_p10)
}
  0x82   : > { %s1183_s17 = smov 128   ;;  %p1705_p8 = scmp.ne.s32.totalorder %s1698_s12, 0 }
  0x83   : > { %787 = dma.hbm_to_vmem [thread:$0]  (!%p1704_p13), %s1451_s16, 1024, %s1477_s0, %s1343_s7, %s1183_s17, %s1703_s26, %s1702_s23  }
  0x84   : > { %265 = sbr.rel (%p1705_p8) target bundleno = 667 (0x29b), region = 40  ;;  %s267_s5 = sand.u32 (!%p1705_p8), 1, %s1375_s28  }
  0x85   : > { %s269_s2 = sand.u32 (!%p1705_p8), 1, %s1152_s25   ;;  %s268_s14 = scalar_lea.sflag (!%p1705_p8), [#allocation4], %s267_s5 }
  0x86   : > { %s691_s27 = sshll.u32 (!%p1705_p8), %s269_s2, 3  ;;  %p1706_p2 = scmp.ne.s32.totalorder (!%p1705_p8), %s1691_s9, 0 }
  0x87   : > { %s271_s13 = scalar_lea.vmem (!%p1705_p8), [#allocation3], %s691_s27 }
  0x8b   : > { %1107 = dma.done.wait (%p1706_p2), %s268_s14, 128  }
  0x8c   : > { %1109 = vsyncadd (%p1706_p2), %s268_s14, 4294967168  ;;  %p1707_p0 = scmp.eq.s32.totalorder %s1375_s28, 0 }
  0x8e   : > { %1111 = dma.done.wait (%p1707_p0), [#allocation7], 256   ;;  %p1708_p13 = pmov %p1707_p0 }
  0x8f   : > { %s282_s0 = sand.u32 1, %s1140_s22   ;;  %p1709_p7 = scmp.ne.s32.totalorder %s1695_s24, 0 }
  0x90   : > { %1113 = vsyncadd (%p1708_p13), [#allocation7], 4294967040  ;;  %s693_s16 = sshll.u32 %s282_s0, 6 }
  0x91   : > { %s1520_s7 = scalar_lea.vmem [#allocation8], %s693_s16 }
  0x92   : > { %1115 = dma.done.wait (%p1709_p7), %s268_s14, 1024  }
  0x93   : > { %1117 = vsyncadd (%p1709_p7), %s268_s14, 4294966272  ;;  %s1710_s9 = sld [smem:[#allocation16_spill]]  ;;  %s316_s12 = sand.u32 1, %s1128_s19  }
  0x94   : > { %s1530_s28 = sshll.u32 %s316_s12, 3  ;;  %s1711_s8 = sld [smem:[#allocation27_spill]] }
  0x95   : > { %s318_s10 = scalar_lea.vmem [#allocation9], %s1530_s28 }
  0x99   : > { %p320_p1 = scmp.lt.s32.totalorder %s1710_s9, 1  ;;  %p695_p3 = scmp.ne.s32.totalorder %s1710_s9, 0 }
  0x9a   : > { %v919_v0 = vld [vmem:[#allocation6] sm:$0xff] (!%p695_p3)   ;;  %v1184_v1 = vmov (!%p695_p3), 0.0   ;;  %v920_v2 = vld [vmem:[#allocation6 + $0x8] sm:$0xff] (!%p695_p3)   ;;  %vm1185_vm0 = vmmov (!%p695_p3), 0   ;;  %v921_v3 = vld [vmem:[%s271_s13] sm:$0xff] (!%p695_p3)   ;;  %vm359_vm1 = vcmask (!%p695_p3), 261120  }
  0x9b   : > { %s1533_s4 = scalar_select %p320_p1, %s1710_s9, 1 }
  0x9c   : > { %328 = sbr.rel (%p695_p3) target bundleno = 400 (0x190), region = 56  ;;  %739 = vmatprep.subr.bf16.mxu0 (!%p695_p3), %v1184_v1  ;;  %743 = vmatprep.mubr.msk.bf16.mxu0 (!%p695_p3), %vm1185_vm0, %v1184_v1  ;;  %s1712_s29 = sld [smem:[#allocation26_spill]] (!%p695_p3) }
  0x9d   : > { %s322_s15 = scalar_lea.vmem %s1711_s8, %s1533_s4  ;;  %740 = vmatpush3.bf16.msra.mxu0 (!%p695_p3), %v919_v0 }
  0x9e   : > { %741 = vmatprep.subr.bf16.mxu0 (!%p695_p3), %v1184_v1 }
  0xa1   : > { %742 = vmatpush3.bf16.msra.mxu0 (!%p695_p3), %v920_v2 }
  0xa2   : > { %v696_v4 = vld [vmem:[%s1712_s29] ss:$0 sm:$0xff] (!%p695_p3) }
  0xa4   : > { %744 = vmatmul.mubr.msk.bf16.vlgmr.msra.gmra.mrb[0].mxu0 %vm359_vm1, %v921_v3 }
 0x177   : > { %v397_v5 = vpop.f32.mrb[0].mxu0 }
 0x178   : > { %v398_v6 = vadd.f32 %v696_v4, %v397_v5  ;;  %v745_v7 = vpop.f32.mrb[1].mxu0 }
 0x179   : > { %v400_v8 = vpop.f32.mrb[2].mxu0 }
 0x17a   : > { %v406_v9 = vmul.f32 0.70710677, %v398_v6  ;;  %v401_v10 = vadd.f32 %v696_v4, %v400_v8  ;;  %v746_v11 = vpop.f32.mrb[3].mxu0  ;;  %v404_v16 = vmul.f32 0.5, %v398_v6 }
 0x17c   : > { %922 = verf.f32 %v406_v9  ;;  %v407_v12 = vmul.f32 0.70710677, %v401_v10  ;;  %v405_v17 = vmul.f32 0.5, %v401_v10 }
 0x17e   : > { %924 = verf.f32 %v407_v12 }
 0x186   : > { %v923_v13 = vpop.eup %922 }
 0x187   : > { %v410_v14 = vadd.f32 1.0, %v923_v13 }
 0x188   : > { %v925_v15 = vpop.eup %924 }
 0x189   : > { %v411_v18 = vadd.f32 1.0, %v925_v15  ;;  %v412_v19 = vmul.f32 %v410_v14, %v404_v16 }
 0x18b   : > { %v413_v20 = vmul.f32 %v411_v18, %v405_v17 }
 0x18d   : > { %v414_v21 = vpack.c.bf16 %v413_v20, %v412_v19 }
 0x18f   : > { %415 = vst [vmem:[#allocation2] sm:$0xff] %v414_v21 }
 0x190 PF: > { %v926_v22 = vld [vmem:[%s1520_s7] sm:$0xff]   ;;  %v1186_v23 = vmov 0.0   ;;  %v927_v24 = vld [vmem:[%s1520_s7 + $0x8] sm:$0xff]   ;;  %vm1187_vm2 = vmmov 0   ;;  %v928_v25 = vld [vmem:[%s1520_s7 + $0x10] sm:$0xff]   ;;  %s1713_s17 = sld [smem:[#allocation17_spill]] }
 0x191   : > { %747 = vmatprep.subr.bf16.mxu0 %v1186_v23  ;;  %763 = vmatprep.mubr.msk.bf16.mxu0 %vm1187_vm2, %v1186_v23  ;;  %v929_v26 = vld [vmem:[%s1520_s7 + $0x18] sm:$0xff]   ;;  %s1714_s5 = sld [smem:[#allocation16_spill]]  ;;  %v930_v27 = vld [vmem:[%s1520_s7 + $0x20] sm:$0xff]   ;;  %v931_v28 = vld [vmem:[%s1520_s7 + $0x28] sm:$0xff]   ;;  %s555_s9 = sshll.u32 %s318_s10, 4  ;;  %s1566_s9 = int_to_ptr.vmem [resolvable:$true] %s555_s9 }
 0x192   : > { %748 = vmatpush3.bf16.msra.mxu0 %v926_v22  ;;  %v932_v29 = vld [vmem:[%s1520_s7 + $0x30] sm:$0xff]   ;;  %v933_v30 = vld [vmem:[%s1520_s7 + $0x38] sm:$0xff]   ;;  %s1716_s26 = sld [smem:[#allocation28_spill]]  ;;  %s1572_s4 = scalar_lea.sflag [#allocation5], %s316_s12 }
 0x193   : > { %749 = vmatprep.subr.bf16.mxu0 %v1186_v23  ;;  %v701_v32 = vld [vmem:[%s322_s15] ss:$0 sm:$0xff]  ;;  %s1022_s15 = scalar_lea.vmem %s1566_s9, 128  ;;  %p1718_p9 = scmp.ne.s32.totalorder %s1696_s21, 0 }
 0x194   : > { %p1023_p11 = scmp.ne.s32.totalorder %s1566_s9, %s1022_s15  ;;  %s1188_s30 = smov [#allocation9]  }
 0x195   : > { %s1026_s29 = sshll.u32 %s1188_s30, 4  ;;  %s1027_s29 = int_to_ptr.vmem [resolvable:$false] %s1026_s29 }
 0x196   : > { %750 = vmatpush3.bf16.msra.mxu0 %v927_v24  ;;  %v416_v31 = vld [vmem:[#allocation2] sm:$0xff]  ;;  %s721_s2 = sshll.u32 %s1713_s17, 2  ;;  %p1024_p12 = pnand %p1023_p11, %p1718_p9 }
 0x197   : > { %751 = vmatprep.subr.bf16.mxu0 %v1186_v23  ;;  %s552_s27 = sadd.s32 %s1714_s5, %s721_s2  ;;  %s1028_s17 = scalar_lea.vmem %s1027_s29, 256 }
 0x198   : > { %s715_s16 = sshll.u32 %s552_s27, 6  ;;  %s1717_s8 = smov %s1716_s26 }
 0x199   : > { %s1564_s24 = scalar_lea.hbm %s1716_s26, %s715_s16  ;;  %p1025_p6 = pneg %p1024_p12 }
 0x19a   : > { %752 = vmatpush3.bf16.msra.mxu0 %v928_v25  ;;  %p1029_p5 = scmp.lt.s32.totalorder %s1566_s9, %s1027_s29  ;;  %p1030_p4 = scmp.lt.s32.totalorder %s1028_s17, %s1022_s15 }
 0x19b   : > { %753 = vmatprep.subr.bf16.mxu0 %v1186_v23 }
 0x19c   : > { %p1031_p10 = por %p1030_p4, %p1029_p5 }
 0x19e   : > { %754 = vmatpush3.bf16.msra.mxu0 %v929_v26  ;;  %p1032_p8 = pnand %p1031_p10, %p1025_p6 }
 0x19f   : > { %755 = vmatprep.subr.bf16.mxu0 %v1186_v23 }
 0x1a2   : > { %756 = vmatpush3.bf16.msra.mxu0 %v930_v27 }
 0x1a3   : > { %757 = vmatprep.subr.bf16.mxu0 %v1186_v23 }
 0x1a6   : > { %758 = vmatpush3.bf16.msra.mxu0 %v931_v28 }
 0x1a7   : > { %759 = vmatprep.subr.bf16.mxu0 %v1186_v23 }
 0x1aa   : > { %760 = vmatpush3.bf16.msra.mxu0 %v932_v29 }
 0x1ab   : > { %761 = vmatprep.subr.bf16.mxu0 %v1186_v23 }
 0x1ae   : > { %762 = vmatpush3.bf16.msra.mxu0 %v933_v30 }
 0x1b1   : > { %764 = vmatmul.mubr.bf16.vlgmr.msra.gmra.mrb[0].mxu0 %v416_v31 }
 0x284   : > { %v522_v33 = vpop.f32.mrb[0].mxu0 }
 0x285   : > { %v765_v34 = vpop.f32.mrb[1].mxu0  ;;  %v523_v36 = vadd.f32 %v701_v32, %v522_v33 }
 0x286   : > { %v525_v35 = vpop.f32.mrb[2].mxu0 }
 0x287   : > { %v526_v37 = vadd.f32 %v701_v32, %v525_v35  ;;  %v766_v38 = vpop.f32.mrb[3].mxu0 }
 0x289   : > { %v725_v39 = vpack.c.bf16 %v526_v37, %v523_v36 }
 0x28b   : > { %726 = vst [vmem:[%s318_s10] sm:$0xff] %v725_v39  }
 0x28c   : > { %1035 = shalt.err (!%p1032_p8)
}
 0x28d   : > { %s1036_s12 = scalar_lea.hbm %s1564_s24, 128  ;;  %s1040_s5 = scalar_lea.hbm %s1717_s8, 512 }
 0x28e   : > { %p1037_p2 = scmp.ne.s32.totalorder %s1564_s24, %s1036_s12  ;;  %p1041_p7 = scmp.lt.u32.totalorder %s1564_s24, %s1717_s8 }
 0x28f   : > { %p1042_p1 = scmp.lt.u32.totalorder %s1040_s5, %s1036_s12  ;;  %p1044_p11 = scmp.lt.u32.totalorder %s1036_s12, %s1564_s24 }
 0x290   : > { %p1038_p0 = pnand %p1037_p2, %p1718_p9 }
 0x291   : > { %p1043_p3 = por %p1042_p1, %p1041_p7 }
 0x292   : > { %p1039_p13 = pneg %p1038_p0 }
 0x293   : > { %p1045_p12 = por %p1044_p11, %p1043_p3 }
 0x295   : > { %p1046_p6 = pnand %p1045_p12, %p1039_p13 }
 0x297   : > { %1049 = shalt.err (!%p1046_p6)
}
 0x298   : > { %s1189_s14 = smov 64   ;;  %s1190_s13 = smov 128  }
 0x299   : > { %s1191_s0 = smov 4  }
 0x29a   : > { %775 = dma.vmem_to_hbm [thread:$0]  (%p1718_p9), %s1566_s9, 128, %s1564_s24, %s1572_s4, %s1189_s14, %s1190_s13, %s1191_s0  }
 0x29b PF: > { %p795_p5 = scmp.ge.s32.totalorder %s1176_s6, 2  ;;  %s570_s16 = sand.u32 1, %s1124_s18  }
 0x29c   : > { %p1719_p4 = scmp.ne.s32.totalorder %s1697_s11, 0  ;;  %s571_s7 = scalar_lea.sflag [#allocation5], %s570_s16 }
 0x29e   : > { %p789_p10 = pnand %p795_p5, %p1719_p4 }
 0x2a0   : > { %1119 = dma.done.wait (!%p789_p10), %s571_s7, 128  }
 0x2a1   : > { %1121 = vsyncadd (!%p789_p10), %s571_s7, 4294967168  ;;  %s22_s6 = sadd.s32 1, %s1176_s6   ;;  %s1721_s21 = sld [smem:[#allocation23_spill]] }
 0x2a2   : > { %p1601_p8 = scmp.ge.s32.totalorder %s22_s6, 6   ;;  %s1722_s9 = sld [smem:[#allocation14_spill]] }
 0x2a3   : > { %s1723_s26 = sld [smem:[#allocation24_spill]]  ;;  %s1724_s4 = sld [smem:[#allocation15_spill]] }
 0x2a4   : > { %s1725_s15 = sld [smem:[#allocation22_spill]]  ;;  %s1726_s27 = sld [smem:[#allocation18_spill]] }
 0x2a5   : > { %s1727_s28 = sld [smem:[#allocation19_spill]]  ;;  %s1728_s29 = sld [smem:[#allocation20_spill]] }
 0x2a6   : > { %s1729_s30 = sld [smem:[#allocation21_spill]]  ;;  %s1731_s18 = smov %s1128_s19 }
 0x2a7   : > { %s1732_s19 = smov %s1132_s20  ;;  %s1733_s20 = smov %s1721_s21 }
 0x2a8   : > { %s1734_s21 = smov %s1140_s22  ;;  %s1735_s22 = smov %s1722_s9 }
 0x2a9   : > { %s1736_s23 = smov %s1723_s26  ;;  %s1737_s24 = smov %s1152_s25 }
 0x2aa   : > { %s1738_s25 = smov %s1724_s4  ;;  %s1739_s26 = smov %s1725_s15 }
 0x2ab   :  { %21 = sbr.rel (!%p1601_p8) target bundleno = 16 (0x10), region = 107 }
 0x2b2   :  { %576 = vsyncpa [#allocation4], 1 }
 0x2b3   :  { %578 = vsyncpa [#allocation4 + $0x1], 1 }
 0x2b4   :  { %579 = vsyncpa [#allocation7], 1 }
 0x2b5   :  { %580 = vsyncpa [#allocation5], 1 }
 0x2b6   :  { %582 = vsyncpa [#allocation5 + $0x1], 1 }

</bundles_post_ra>
